<compile_context>
chip_gen: v5e
topology: v5e:2x2
jax: 0.10.0
libtpu: 0.0.40
codegen_flags: <defaults>
</compile_context>

<pallas_src>
import numpy as np
import jax
import jax.numpy as jnp
from jax.experimental import pallas as pl
from jax.experimental.pallas import tpu as pltpu

LOGPI = float(np.log(np.pi))

_TARGET_TILE_BYTES = 2 * 1024 * 1024    # per-buffer tile size (~roofline knee)
_MIN_SPLIT_BYTES = 2 * 1024 * 1024      # force >= 2 grid steps above this
_VMEM_LIMIT_BYTES = 32 * 1024 * 1024    # safe on v5e/v6e (128 MiB) and v7x (64 MiB)
_FLAT_LANE_WIDTHS = (2048, 1024, 512, 256, 128)


def _round_up(x, m):
    return (x + m - 1) // m * m


def _htf_kernel(c_ref, x_ref, o_ref):
    # c_ref: (2,) float32 scalars in SMEM (scalar-prefetched):
    #   c1 = log(alpha) - 0.5*log(pi),  c2 = alpha*alpha
    # x_ref / o_ref: (tm, N) VMEM tiles.  Compute in f32, cast once at store.
    c1 = c_ref[0]
    c2 = c_ref[1]
    x = x_ref[...].astype(jnp.float32)
    o_ref[...] = (c1 - (x * x) * c2).astype(o_ref.dtype)


def harmonic_trial_forward(x, alpha, *, tm=None):
    """Elementwise log|psi_T|^2 for the harmonic trial function.

    x: any-rank float array, alpha: positive scalar.  Returns x.shape / x.dtype.
    Note: alpha <= 0 yields NaN/-inf from log, matching the PyTorch reference.
    """
    orig_shape = x.shape
    # Collapse to 2-D (rows, lanes).
    if x.ndim == 0:
        x2 = x.reshape(1, 1)
    elif x.ndim == 1:
        x2 = x.reshape(1, -1)
    else:
        x2 = x.reshape(-1, x.shape[-1])
    M, N = x2.shape
    itemsize = jnp.dtype(x.dtype).itemsize

    # Lane-dense re-slab: narrow or non-128-multiple trailing dims (or rows
    # wider than a tile) are reshaped into a wide 128-multiple lane width.
    # This is a free metadata reshape for contiguous row-major data and gives
    # unmasked, lane-dense stores regardless of the caller's trailing dim.
    if N % 128 != 0 or N < 512 or N * itemsize > _TARGET_TILE_BYTES:
        total = M * N
        for lane_w in _FLAT_LANE_WIDTHS:
            if total % lane_w == 0:
                M, N = total // lane_w, lane_w
                x2 = x2.reshape(M, N)
                break

    # Row alignment: 8 rows per vreg for f32, 16 for bf16, 32 for 8-bit.
    row_align = max(8, 32 // itemsize)
    total_bytes = M * N * itemsize

    if tm is None:
        tm = (_TARGET_TILE_BYTES // max(1, N * itemsize)) // row_align * row_align
        tm = max(row_align, tm)
        if tm >= M and total_bytes > _MIN_SPLIT_BYTES:
            # Keep >= 2 grid steps: lets the DMA pipeline overlap read/write
            # and shards the row grid across both v7x TensorCores.
            tm = max(row_align, _round_up(pl.cdiv(M, 2), row_align))
    else:
        tm = max(row_align, _round_up(tm, row_align))
    tm = min(tm, M)   # small inputs: one block whose shape equals the array

    grid = (pl.cdiv(M, tm),)   # ragged last block clipped by Pallas (no pad/slice)

    # Hoisted scalar constants, kept in float32 (no downcast before the math).
    a = jnp.asarray(alpha, dtype=jnp.float32)
    consts = jnp.stack([jnp.log(a) - 0.5 * LOGPI, a * a])

    out2 = pl.pallas_call(
        _htf_kernel,
        out_shape=jax.ShapeDtypeStruct((M, N), x.dtype),
        grid_spec=pltpu.PrefetchScalarGridSpec(
            num_scalar_prefetch=1,
            grid=grid,
            in_specs=[pl.BlockSpec((tm, N), lambda i, c: (i, 0))],
            out_specs=pl.BlockSpec((tm, N), lambda i, c: (i, 0)),
        ),
        compiler_params=pltpu.CompilerParams(
            dimension_semantics=("parallel",),
            vmem_limit_bytes=_VMEM_LIMIT_BYTES,
        ),
        cost_estimate=pl.CostEstimate(
            flops=2 * M * N,                       # one mul + one mul-subtract
            transcendentals=0,
            bytes_accessed=2 * M * N * itemsize,   # one read + one write
        ),
    )(consts, x2)

    return out2.reshape(orig_shape)


def harmonic_trial_forward_ref(x, alpha):
    # Pure-JAX reference matching the PyTorch forward (promotes to f32).
    a = jnp.float32(alpha)
    xf = x.astype(jnp.float32)
    return 2.0 * (0.5 * jnp.log(a) - 0.25 * LOGPI - 0.5 * xf * xf * a * a)


if __name__ == "__main__":
    key = jax.random.PRNGKey(0)
    alpha = jnp.float32(0.9)

    # Small walker batch: 16 walkers x 256 coordinates, f32 (re-slabbed path).
    x = jax.random.normal(key, (16, 256), dtype=jnp.float32)
    out = jax.block_until_ready(harmonic_trial_forward(x, alpha))
    np.testing.assert_allclose(np.asarray(out),
                               np.asarray(harmonic_trial_forward_ref(x, alpha)),
                               rtol=1e-5, atol=1e-6)

    # Ragged multi-step grid path (odd row count after re-slab, forced tile).
    x2 = jax.random.normal(jax.random.PRNGKey(1), (50, 384), dtype=jnp.float32)
    out2 = jax.block_until_ready(harmonic_trial_forward(x2, alpha, tm=16))
    np.testing.assert_allclose(np.asarray(out2),
                               np.asarray(harmonic_trial_forward_ref(x2, alpha)),
                               rtol=1e-5, atol=1e-6)

    # Larger array: exercises >= 2 grid steps / pipelined path.
    x3 = jax.random.normal(jax.random.PRNGKey(2), (2048, 512), dtype=jnp.float32)
    out3 = jax.block_until_ready(harmonic_trial_forward(x3, alpha))
    np.testing.assert_allclose(np.asarray(out3),
                               np.asarray(harmonic_trial_forward_ref(x3, alpha)),
                               rtol=1e-5, atol=1e-6)

    # bf16 input: f32 compute inside the kernel, single cast at the store.
    x4 = jax.random.normal(jax.random.PRNGKey(3), (64, 320), dtype=jnp.bfloat16)
    out4 = jax.block_until_ready(harmonic_trial_forward(x4, alpha))
    ref4 = harmonic_trial_forward_ref(x4, alpha).astype(jnp.bfloat16)
    np.testing.assert_allclose(np.asarray(out4, dtype=np.float32),
                               np.asarray(ref4, dtype=np.float32),
                               rtol=2e-2, atol=1e-2)

    print("KERNEL_OK")
</pallas_src>

<mosaic_0001>
module attributes {stable_mosaic.version = 11 : i64} {
  func.func @_htf_kernel(%arg0: i32, %arg1: memref<2xf32, #tpu.memory_space<smem>>, %arg2: memref<2x2048xf32, #tpu.memory_space<vmem>>, %arg3: memref<2x2048xf32, #tpu.memory_space<vmem>>) attributes {dimension_semantics = [#tpu.dimension_semantics<parallel>], iteration_bounds = array<i64: 1>, scalar_prefetch = 1 : i64, scratch_operands = 0 : i64, tpu.core_type = #tpu.core_type<tc>, window_params = [{transform_indices = @transform_0, window_bounds = array<i64: 2, 2048>}, {transform_indices = @transform_1, window_bounds = array<i64: 2, 2048>}]} {
    %c0 = arith.constant 0 : index
    %0 = memref.load %arg1[%c0] : memref<2xf32, #tpu.memory_space<smem>>
    %c1 = arith.constant 1 : index
    %1 = memref.load %arg1[%c1] : memref<2xf32, #tpu.memory_space<smem>>
    %c0_0 = arith.constant 0 : index
    %c0_1 = arith.constant 0 : index
    %2 = vector.load %arg2[%c0_0, %c0_1] : memref<2x2048xf32, #tpu.memory_space<vmem>>, vector<2x2048xf32>
    %3 = arith.mulf %2, %2 : vector<2x2048xf32>
    %4 = vector.broadcast %1 : f32 to vector<2x2048xf32>
    %5 = arith.mulf %3, %4 : vector<2x2048xf32>
    %6 = vector.broadcast %0 : f32 to vector<2x2048xf32>
    %7 = arith.subf %6, %5 : vector<2x2048xf32>
    %c0_2 = arith.constant 0 : index
    %c0_3 = arith.constant 0 : index
    %8 = vector.load %arg3[%c0_2, %c0_3] : memref<2x2048xf32, #tpu.memory_space<vmem>>, vector<2x2048xf32>
    tpu.vector_store %arg3[%c0_2, %c0_3], %7 {strides = array<i32>} : memref<2x2048xf32, #tpu.memory_space<vmem>>, vector<2x2048xf32>,
    return
  }
  func.func @transform_0(%arg0: i32, %arg1: memref<2xf32, #tpu.memory_space<smem>>) -> (i32, i32) {
    %c0_i32 = arith.constant 0 : i32
    %c0_i32_0 = arith.constant 0 : i32
    return %arg0, %c0_i32 : i32, i32
  }
  func.func @transform_1(%arg0: i32, %arg1: memref<2xf32, #tpu.memory_space<smem>>) -> (i32, i32) {
    %c0_i32 = arith.constant 0 : i32
    %c0_i32_0 = arith.constant 0 : i32
    return %arg0, %c0_i32 : i32, i32
  }
}

</mosaic_0001>

<bundles_post_ra>
// kernel: tpu_custom_call.1
= control target key start
LH: loop header
LB: loop body
LE: loop exit
PB: predicated region body
PF: predicated region fallthrough
CT: control target
= control target key end

     0   :  { %s143_s12 = smov [#allocation3]   ;;  %s170_s0 = inlined_call_operand.hbm [shape: f32[2], index: 0, kind: input, shape index: {}]   ;;  %s171_s1 = inlined_call_operand.hbm [shape: f32[2,2048], index: 1, kind: input, shape index: {}]   ;;  %s172_s2 = inlined_call_operand.hbm [shape: f32[2,2048], index: 2, kind: output, shape index: {}]  }
   0x1   :  { %s8_s11 = sshll.u32 %s170_s0, 4  ;;  %s9_s11 = int_to_ptr.hbm [resolvable:$true] %s8_s11 }
   0x2   :  { %11 = dma.hbm_to_smem %s9_s11, 16, %s143_s12, [#allocation2] }
   0x3   :  { %137 = dma.done.wait [#allocation2], 16 }
   0x4   :  { %138 = vsyncadd [#allocation2], 4294967280 }
   0x5   :  { %14 = sfence }
   0x6   :  { %15 = vsyncpa [#allocation5], 0 }
   0x7   :  { %16 = vsyncpa [#allocation6], 0  ;;  %s22_s15 = sshll.u32 %s171_s1, 4  ;;  %s144_s16 = smov [#allocation4]   ;;  %s23_s15 = int_to_ptr.hbm [resolvable:$true] %s22_s15 }
   0x8   :  { %s24_s17 = sshll.u32 %s144_s16, 4  ;;  %s25_s17 = int_to_ptr.vmem [resolvable:$true] %s24_s17 }
   0x9   :  { %27 = dma.hbm_to_vmem [thread:$0]  %s23_s15, 512, %s25_s17, [#allocation5]  }
   0xa   :  { %139 = dma.done.wait [#allocation5], 512  }
   0xb   :  { %140 = vsyncadd [#allocation5], 4294966784  ;;  %s32_s0 = sld [smem:[#allocation3]]  ;;  %v34_v0 = vld [vmem:[#allocation4] sm:$0xff]  ;;  %v35_v1 = vld [vmem:[#allocation4 + $0x8] sm:$0xff]  ;;  %s145_s1 = smov [#allocation7]  }
   0xc   :  { %s73_s18 = sld [smem:[#allocation3 + $0x1]]  ;;  %v36_v2 = vld [vmem:[#allocation4 + $0x10] sm:$0xff]  ;;  %v38_v3 = vmul.f32 %v34_v0, %v34_v0  ;;  %v39_v5 = vmul.f32 %v35_v1, %v35_v1  ;;  %v37_v7 = vld [vmem:[#allocation4 + $0x18] sm:$0xff]  ;;  %s61_s19 = sshll.u32 %s145_s1, 4  ;;  %s62_s19 = int_to_ptr.vmem [resolvable:$true] %s61_s19 }
   0xd   :  { %v40_v6 = vmul.f32 %v36_v2, %v36_v2  ;;  %v41_v9 = vmul.f32 %v37_v7, %v37_v7  ;;  %s63_s22 = sshll.u32 %s172_s2, 4  ;;  %s64_s22 = int_to_ptr.hbm [resolvable:$true] %s63_s22 }
  0x11   :  { %v47_v8 = vstv %s32_s0 }
  0x12   :  { %v42_v4 = vstv %s73_s18 }
  0x13   :  { %v43_v10 = vmul.f32 %v42_v4, %v38_v3  ;;  %v44_v11 = vmul.f32 %v42_v4, %v39_v5  ;;  %v45_v12 = vmul.f32 %v42_v4, %v40_v6  ;;  %v46_v13 = vmul.f32 %v42_v4, %v41_v9 }
  0x15   :  { %v48_v14 = vsub.f32 %v47_v8, %v43_v10  ;;  %v49_v15 = vsub.f32 %v47_v8, %v44_v11  ;;  %v50_v16 = vsub.f32 %v47_v8, %v45_v12  ;;  %v51_v17 = vsub.f32 %v47_v8, %v46_v13 }
  0x17   :  { %52 = vst [vmem:[#allocation7] sm:$0xff] %v48_v14 }
  0x18   :  { %53 = vst [vmem:[#allocation7 + $0x8] sm:$0xff] %v49_v15 }
  0x19   :  { %54 = vst [vmem:[#allocation7 + $0x10] sm:$0xff] %v50_v16 }
  0x1a   :  { %55 = vst [vmem:[#allocation7 + $0x18] sm:$0xff] %v51_v17 }
  0x1b   :  { %66 = dma.vmem_to_hbm [thread:$0]  %s62_s19, 512, %s64_s22, [#allocation6]  }
  0x1c   :  { %141 = dma.done.wait [#allocation6], 512  }
  0x1d   :  { %142 = vsyncadd [#allocation6], 4294966784 }
  0x1e   :  { %71 = vsyncpa [#allocation5], 1 }
  0x1f   :  { %72 = vsyncpa [#allocation6], 1 }

</bundles_post_ra>
